<compile_context>
chip_gen: v7x
topology: tpu7x:2x2x1
jax: 0.10.0
libtpu: 0.0.40
codegen_flags: <defaults>
</compile_context>

<pallas_src>
import functools

import jax
import jax.numpy as jnp
from jax import lax
from jax.experimental import pallas as pl
from jax.experimental.pallas import tpu as pltpu

_LANE = 128
_SUBLANE = 8


def _align_up(v, a):
    return ((v + a - 1) // a) * a


def _focal_pow(one_m_pt, gamma):
    """(1 - p_t) ** gamma, specialised for small integer gamma (no EUP pow)."""
    if gamma == 2.0:
        return one_m_pt * one_m_pt
    if float(gamma).is_integer() and 0.0 < gamma <= 8.0:
        out = one_m_pt
        for _ in range(int(gamma) - 1):
            out = out * one_m_pt
        return out
    return jnp.power(one_m_pt, gamma)


def _elementwise(x, t, valid, *, alpha, gamma):
    """Per-element focal / dice terms.

    `valid` is None (fast path) or a bool mask.  Invalid lanes are zeroed with
    selects so undefined tail data (possibly NaN/Inf) never propagates.
    """
    e = jnp.exp(-jnp.abs(x))                        # one EUP exp per element
    d = 1.0 + e
    inv = pl.reciprocal(d, approx=True)             # EUP vrcp ...
    inv = inv * (2.0 - d * inv)                     # ... + one Newton step
    p = jnp.where(x >= 0.0, inv, e * inv)           # sigmoid(x)
    ce = jnp.maximum(x, 0.0) - x * t + jnp.log1p(e)  # stable BCE-with-logits

    if valid is not None:
        zero = jnp.zeros_like(p)
        p = jnp.where(valid, p, zero)
        t = jnp.where(valid, t, zero)
        ce = jnp.where(valid, ce, zero)             # focal term becomes 0 too

    p_t = p * t + (1.0 - p) * (1.0 - t)
    alpha_t = alpha * t + (1.0 - alpha) * (1.0 - t)
    focal = alpha_t * _focal_pow(1.0 - p_t, gamma) * ce
    return focal, p * t, p, t


def _combined_loss_kernel(x_ref, t_ref, out_ref, *, alpha, gamma, n_valid,
                          block_rows, sub_rows, steps_per_split,
                          covers_exactly):
    """Grid = (num_splits ['parallel'], steps_per_split ['arbitrary']).

    out_ref : (1, 4, 8, 128) f32 block, resident across the inner axis and
              used directly as the accumulator:
        [:,0] focal element sum   [:,1] sum(p*t)   [:,2] sum(p)   [:,3] sum(t)
    """
    c = pl.program_id(0)
    i = pl.program_id(1)

    @pl.when(i == 0)
    def _():
        out_ref[...] = jnp.zeros_like(out_ref)

    logical = c * steps_per_split + i               # logical block-row index
    n_sub = block_rows // sub_rows

    def accumulate(masked):
        def body(j, carry):
            f_acc, i_acc, p_acc, t_acc = carry
            r0 = pl.multiple_of(j * sub_rows, sub_rows)
            x = x_ref[pl.ds(r0, sub_rows), :].astype(jnp.float32)
            t = t_ref[pl.ds(r0, sub_rows), :].astype(jnp.float32)
            if masked:
                row = lax.broadcasted_iota(jnp.int32, (sub_rows, _LANE), 0)
                lane = lax.broadcasted_iota(jnp.int32, (sub_rows, _LANE), 1)
                base = (logical * block_rows + j * sub_rows) * _LANE
                valid = (base + row * _LANE + lane) < n_valid
            else:
                valid = None
            focal, pt, p, tt = _elementwise(x, t, valid, alpha=alpha,
                                            gamma=gamma)

            def fold(v):  # (sub_rows, 128) -> (8, 128) with pure vreg adds
                return jnp.sum(
                    v.reshape(sub_rows // _SUBLANE, _SUBLANE, _LANE), axis=0)

            return (f_acc + fold(focal), i_acc + fold(pt),
                    p_acc + fold(p), t_acc + fold(tt))

        zero = jnp.zeros((_SUBLANE, _LANE), jnp.float32)
        f_acc, i_acc, p_acc, t_acc = lax.fori_loop(
            0, n_sub, body, (zero, zero, zero, zero))
        out_ref[0, 0] += f_acc
        out_ref[0, 1] += i_acc
        out_ref[0, 2] += p_acc
        out_ref[0, 3] += t_acc

    if covers_exactly:
        # Statically known: no block can ever see an invalid element.
        accumulate(masked=False)
    else:
        # Only blocks whose element range extends past n need the mask; the
        # steady-state blocks run the mask-free path.  (Covers the lane pad,
        # the partial final block, and clamped duplicate trailing steps.)
        needs_mask = (logical + 1) * (block_rows * _LANE) > n_valid

        @pl.when(jnp.logical_not(needs_mask))
        def _():
            accumulate(masked=False)

        @pl.when(needs_mask)
        def _():
            accumulate(masked=True)


def combined_loss(inputs, targets, *, focal_weight=1.0, dice_weight=1.0,
                  focal_alpha=0.25, focal_gamma=2.0, dice_smooth=1.0,
                  block_rows=2048, sub_rows=256, num_splits=2):
    """JAX/Pallas equivalent of CombinedLoss.forward (pos_weight=None).

    Inputs are streamed in their native dtype and upcast to f32 in-register;
    on bandwidth-bound v5e/v6e pass bf16 logits/targets from the caller.
    """
    x = jnp.reshape(inputs, (-1,))
    t = jnp.reshape(targets, (-1,))
    n = x.shape[0]
    if t.shape[0] != n:
        raise ValueError("inputs/targets element counts differ")
    if n >= 2**31 - block_rows * _LANE:
        raise ValueError("element count too large for int32 in-kernel indexing")

    rows = pl.cdiv(n, _LANE)

    # Pad only to the 128-lane granularity (<=127 elements).  When n is a lane
    # multiple the reshape below is metadata-only (no HBM copy).
    lane_pad = rows * _LANE - n
    if lane_pad:
        x = jnp.pad(x, (0, lane_pad))
        t = jnp.pad(t, (0, lane_pad))
    x2 = x.reshape(rows, _LANE)
    t2 = t.reshape(rows, _LANE)

    # Tile sizing: sub_rows | block_rows, both sublane-aligned, clamped so a
    # tiny input does not get a huge mostly-padded block.
    sr = max(_SUBLANE, (min(sub_rows, block_rows) // _SUBLANE) * _SUBLANE)
    sr = min(sr, _align_up(rows, _SUBLANE))
    br = min(_align_up(block_rows, sr), _align_up(rows, sr))

    total_steps = pl.cdiv(rows, br)
    ns = max(1, min(num_splits, total_steps))       # 'parallel' splits (v7x 2-TC)
    spc = pl.cdiv(total_steps, ns)                  # steps per split
    covers_exactly = (ns * spc * br * _LANE == n)

    def in_map(c, i):
        # Clamp so trailing duplicate steps of the last split stay in-bounds;
        # their contribution is fully masked out inside the kernel.
        return (jnp.minimum(c * spc + i, total_steps - 1), 0)

    kernel = functools.partial(
        _combined_loss_kernel,
        alpha=float(focal_alpha), gamma=float(focal_gamma), n_valid=n,
        block_rows=br, sub_rows=sr, steps_per_split=spc,
        covers_exactly=covers_exactly)

    partials = pl.pallas_call(
        kernel,
        out_shape=jax.ShapeDtypeStruct((ns, 4, _SUBLANE, _LANE), jnp.float32),
        grid_spec=pltpu.PrefetchScalarGridSpec(
            num_scalar_prefetch=0,
            grid=(ns, spc),
            in_specs=[
                pl.BlockSpec((br, _LANE), in_map),
                pl.BlockSpec((br, _LANE), in_map),
            ],
            out_specs=pl.BlockSpec((1, 4, _SUBLANE, _LANE),
                                   lambda c, i: (c, 0, 0, 0)),
        ),
        compiler_params=pltpu.CompilerParams(
            dimension_semantics=("parallel", "arbitrary")),
    )(x2, t2)

    sums = jnp.sum(partials, axis=(0, 2, 3))        # (4,) scalars
    focal_sum, intersection, p_sum, t_sum = sums[0], sums[1], sums[2], sums[3]

    focal = focal_sum / jnp.float32(n)              # reduction='mean'
    dice_coeff = (2.0 * intersection + dice_smooth) / (p_sum + t_sum + dice_smooth)
    dice = 1.0 - dice_coeff
    total = focal_weight * focal + dice_weight * dice
    return {"focal_loss": focal, "dice_loss": dice, "total_loss": total}


def _reference_jax(inputs, targets, *, focal_alpha=0.25, focal_gamma=2.0,
                   dice_smooth=1.0, focal_weight=1.0, dice_weight=1.0):
    """Pure-JAX reference for a sanity check."""
    x = jnp.reshape(inputs, (-1,)).astype(jnp.float32)
    t = jnp.reshape(targets, (-1,)).astype(jnp.float32)
    p = jax.nn.sigmoid(x)
    ce = jnp.maximum(x, 0.0) - x * t + jnp.log1p(jnp.exp(-jnp.abs(x)))
    p_t = p * t + (1 - p) * (1 - t)
    alpha_t = focal_alpha * t + (1 - focal_alpha) * (1 - t)
    focal = jnp.mean(alpha_t * (1 - p_t) ** focal_gamma * ce)
    inter = jnp.sum(p * t)
    dice = 1.0 - (2.0 * inter + dice_smooth) / (jnp.sum(p) + jnp.sum(t) + dice_smooth)
    return {"focal_loss": focal, "dice_loss": dice,
            "total_loss": focal_weight * focal + dice_weight * dice}


def _check(out, ref, tol=1e-4):
    for k in ("focal_loss", "dice_loss", "total_loss"):
        a, b = float(out[k]), float(ref[k])
        assert abs(a - b) < tol, (k, a, b)


if __name__ == "__main__":
    key = jax.random.PRNGKey(0)
    k1, k2, k3, k4, k5, k6 = jax.random.split(key, 6)

    # Case 1: small [N, 1] logits / [N] labels, like the PyTorch module.
    N1 = 256
    logits1 = jax.random.normal(k1, (N1, 1), dtype=jnp.float32) * 2.0
    labels1 = (jax.random.uniform(k2, (N1,)) > 0.7).astype(jnp.float32)
    out1 = jax.tree_util.tree_map(jax.block_until_ready,
                                  combined_loss(logits1, labels1))
    _check(out1, _reference_jax(logits1, labels1))

    # Case 2: ragged size + tiny block -> multi-step grid with masked tail.
    N2 = 5000
    logits2 = jax.random.normal(k3, (N2, 1), dtype=jnp.float32) * 3.0
    labels2 = (jax.random.uniform(k4, (N2,)) > 0.5).astype(jnp.float32)
    out2 = jax.tree_util.tree_map(
        jax.block_until_ready,
        combined_loss(logits2, labels2, block_rows=32, sub_rows=16))
    _check(out2, _reference_jax(logits2, labels2))

    # Case 3: non-lane-multiple size where the dual-split grid has a clamped
    # duplicate trailing step on the second split (fully masked out).
    N3 = 40000
    logits3 = jax.random.normal(k5, (N3,), dtype=jnp.float32) * 2.5
    labels3 = (jax.random.uniform(k6, (N3,)) > 0.8).astype(jnp.float32)
    out3 = jax.tree_util.tree_map(
        jax.block_until_ready, combined_loss(logits3, labels3, block_rows=128))
    _check(out3, _reference_jax(logits3, labels3))

    print("KERNEL_OK")
</pallas_src>

<mosaic_0001>
module attributes {stable_mosaic.version = 11 : i64} {
  func.func @_combined_loss_kernel(%arg0: i32, %arg1: i32, %arg2: memref<8x128xf32, #tpu.memory_space<vmem>>, %arg3: memref<8x128xf32, #tpu.memory_space<vmem>>, %arg4: memref<1x4x8x128xf32, #tpu.memory_space<vmem>>) attributes {dimension_semantics = [#tpu.dimension_semantics<parallel>, #tpu.dimension_semantics<arbitrary>], iteration_bounds = array<i64: 1, 1>, scalar_prefetch = 0 : i64, scratch_operands = 0 : i64, tpu.core_type = #tpu.core_type<tc>, window_params = [{transform_indices = @transform_0, window_bounds = array<i64: 8, 128>}, {transform_indices = @transform_1, window_bounds = array<i64: 8, 128>}, {transform_indices = @transform_2, window_bounds = array<i64: 1, 4, 8, 128>}]} {
    %c0_i32 = arith.constant 0 : i32
    %0 = arith.cmpi eq, %arg1, %c0_i32 : i32
    %1 = arith.extui %0 : i1 to i32
    %c0_i32_0 = arith.constant 0 : i32
    %2 = arith.cmpi ne, %1, %c0_i32_0 : i32
    scf.if %2 {
      %cst = arith.constant 0.000000e+00 : f32
      %13 = vector.broadcast %cst : f32 to vector<1x4x8x128xf32>
      %c0 = arith.constant 0 : index
      %c0_4 = arith.constant 0 : index
      %c0_5 = arith.constant 0 : index
      %c0_6 = arith.constant 0 : index
      %14 = vector.load %arg4[%c0, %c0_4, %c0_5, %c0_6] : memref<1x4x8x128xf32, #tpu.memory_space<vmem>>, vector<1x4x8x128xf32>
      tpu.vector_store %arg4[%c0, %c0_4, %c0_5, %c0_6], %13 {strides = array<i32>} : memref<1x4x8x128xf32, #tpu.memory_space<vmem>>, vector<1x4x8x128xf32>,
    } else {
    }
    %c1_i32 = arith.constant 1 : i32
    %3 = arith.muli %arg0, %c1_i32 : i32
    %4 = arith.addi %3, %arg1 : i32
    %c1_i32_1 = arith.constant 1 : i32
    %5 = arith.addi %4, %c1_i32_1 : i32
    %c1024_i32 = arith.constant 1024 : i32
    %6 = arith.muli %5, %c1024_i32 : i32
    %c256_i32 = arith.constant 256 : i32
    %7 = arith.cmpi sgt, %6, %c256_i32 : i32
    %true = arith.constant true
    %8 = arith.xori %7, %true : i1
    %9 = arith.extui %8 : i1 to i32
    %c0_i32_2 = arith.constant 0 : i32
    %10 = arith.cmpi ne, %9, %c0_i32_2 : i32
    scf.if %10 {
      %cst = arith.constant 0.000000e+00 : f32
      %13 = vector.broadcast %cst : f32 to vector<8x128xf32>
      %c0_i32_4 = arith.constant 0 : i32
      %c8_i32 = arith.constant 8 : i32
      %14 = arith.muli %c0_i32_4, %c8_i32 : i32
      %15 = tpu.assume_multiple %14, 8 : i32
      %16 = arith.index_cast %15 : i32 to index
      %c0 = arith.constant 0 : index
      %17 = vector.load %arg2[%16, %c0] : memref<8x128xf32, #tpu.memory_space<vmem>>, vector<8x128xf32>
      %18 = arith.index_cast %15 : i32 to index
      %c0_5 = arith.constant 0 : index
      %19 = vector.load %arg3[%18, %c0_5] : memref<8x128xf32, #tpu.memory_space<vmem>>, vector<8x128xf32>
      %20 = math.absf %17 : vector<8x128xf32>
      %cst_6 = arith.constant 0.000000e+00 : f32
      %21 = vector.broadcast %cst_6 : f32 to vector<8x128xf32>
      %22 = arith.subf %21, %20 : vector<8x128xf32>
      %23 = math.exp %22 : vector<8x128xf32>
      %cst_7 = arith.constant 1.000000e+00 : f32
      %24 = vector.broadcast %cst_7 : f32 to vector<8x128xf32>
      %25 = arith.addf %24, %23 : vector<8x128xf32>
      %26 = tpu.reciprocal %25 {approx = true} : vector<8x128xf32> -> vector<8x128xf32>
      %27 = arith.mulf %25, %26 : vector<8x128xf32>
      %cst_8 = arith.constant 2.000000e+00 : f32
      %28 = vector.broadcast %cst_8 : f32 to vector<8x128xf32>
      %29 = arith.subf %28, %27 : vector<8x128xf32>
      %30 = arith.mulf %26, %29 : vector<8x128xf32>
      %cst_9 = arith.constant 0.000000e+00 : f32
      %31 = vector.broadcast %cst_9 : f32 to vector<8x128xf32>
      %32 = arith.cmpf oge, %17, %31 : vector<8x128xf32>
      %33 = arith.mulf %23, %30 : vector<8x128xf32>
      %34 = arith.select %32, %30, %33 : vector<8x128xi1>, vector<8x128xf32>
      %cst_10 = arith.constant 0.000000e+00 : f32
      %35 = vector.broadcast %cst_10 : f32 to vector<8x128xf32>
      %36 = arith.maximumf %17, %35 : vector<8x128xf32>
      %37 = arith.mulf %17, %19 : vector<8x128xf32>
      %38 = arith.subf %36, %37 : vector<8x128xf32>
      %39 = math.log1p %23 : vector<8x128xf32>
      %40 = arith.addf %38, %39 : vector<8x128xf32>
      %41 = arith.mulf %34, %19 : vector<8x128xf32>
      %cst_11 = arith.constant 1.000000e+00 : f32
      %42 = vector.broadcast %cst_11 : f32 to vector<8x128xf32>
      %43 = arith.subf %42, %34 : vector<8x128xf32>
      %cst_12 = arith.constant 1.000000e+00 : f32
      %44 = vector.broadcast %cst_12 : f32 to vector<8x128xf32>
      %45 = arith.subf %44, %19 : vector<8x128xf32>
      %46 = arith.mulf %43, %45 : vector<8x128xf32>
      %47 = arith.addf %41, %46 : vector<8x128xf32>
      %cst_13 = arith.constant 2.500000e-01 : f32
      %48 = vector.broadcast %cst_13 : f32 to vector<8x128xf32>
      %49 = arith.mulf %48, %19 : vector<8x128xf32>
      %cst_14 = arith.constant 1.000000e+00 : f32
      %50 = vector.broadcast %cst_14 : f32 to vector<8x128xf32>
      %51 = arith.subf %50, %19 : vector<8x128xf32>
      %cst_15 = arith.constant 7.500000e-01 : f32
      %52 = vector.broadcast %cst_15 : f32 to vector<8x128xf32>
      %53 = arith.mulf %52, %51 : vector<8x128xf32>
      %54 = arith.addf %49, %53 : vector<8x128xf32>
      %cst_16 = arith.constant 1.000000e+00 : f32
      %55 = vector.broadcast %cst_16 : f32 to vector<8x128xf32>
      %56 = arith.subf %55, %47 : vector<8x128xf32>
      %57 = arith.mulf %56, %56 : vector<8x128xf32>
      %58 = arith.mulf %54, %57 : vector<8x128xf32>
      %59 = arith.mulf %58, %40 : vector<8x128xf32>
      %60 = arith.mulf %34, %19 : vector<8x128xf32>
      %61 = vector.shape_cast %59 : vector<8x128xf32> to vector<1x8x128xf32>
      %cst_17 = arith.constant dense<0.000000e+00> : vector<8x128xf32>
      %62 = vector.multi_reduction <add>, %61, %cst_17 [0] : vector<1x8x128xf32> to vector<8x128xf32>
      %63 = arith.addf %13, %62 : vector<8x128xf32>
      %64 = vector.shape_cast %60 : vector<8x128xf32> to vector<1x8x128xf32>
      %cst_18 = arith.constant dense<0.000000e+00> : vector<8x128xf32>
      %65 = vector.multi_reduction <add>, %64, %cst_18 [0] : vector<1x8x128xf32> to vector<8x128xf32>
      %66 = arith.addf %13, %65 : vector<8x128xf32>
      %67 = vector.shape_cast %34 : vector<8x128xf32> to vector<1x8x128xf32>
      %cst_19 = arith.constant dense<0.000000e+00> : vector<8x128xf32>
      %68 = vector.multi_reduction <add>, %67, %cst_19 [0] : vector<1x8x128xf32> to vector<8x128xf32>
      %69 = arith.addf %13, %68 : vector<8x128xf32>
      %70 = vector.shape_cast %19 : vector<8x128xf32> to vector<1x8x128xf32>
      %cst_20 = arith.constant dense<0.000000e+00> : vector<8x128xf32>
      %71 = vector.multi_reduction <add>, %70, %cst_20 [0] : vector<1x8x128xf32> to vector<8x128xf32>
      %72 = arith.addf %13, %71 : vector<8x128xf32>
      %c1_i32_21 = arith.constant 1 : i32
      %c0_22 = arith.constant 0 : index
      %c0_23 = arith.constant 0 : index
      %c0_24 = arith.constant 0 : index
      %c0_25 = arith.constant 0 : index
      %73 = vector.load %arg4[%c0_22, %c0_23, %c0_24, %c0_25] : memref<1x4x8x128xf32, #tpu.memory_space<vmem>>, vector<1x1x8x128xf32>
      %74 = vector.shape_cast %73 : vector<1x1x8x128xf32> to vector<8x128xf32>
      %75 = arith.addf %74, %63 : vector<8x128xf32>
      %c0_26 = arith.constant 0 : index
      %c0_27 = arith.constant 0 : index
      %c0_28 = arith.constant 0 : index
      %c0_29 = arith.constant 0 : index
      %76 = vector.load %arg4[%c0_26, %c0_27, %c0_28, %c0_29] : memref<1x4x8x128xf32, #tpu.memory_space<vmem>>, vector<1x1x8x128xf32>
      %77 = vector.shape_cast %76 : vector<1x1x8x128xf32> to vector<8x128xf32>
      %78 = vector.shape_cast %75 : vector<8x128xf32> to vector<1x1x8x128xf32>
      tpu.vector_store %arg4[%c0_26, %c0_27, %c0_28, %c0_29], %78 {strides = array<i32>} : memref<1x4x8x128xf32, #tpu.memory_space<vmem>>, vector<1x1x8x128xf32>,
      %c0_30 = arith.constant 0 : index
      %c1 = arith.constant 1 : index
      %c0_31 = arith.constant 0 : index
      %c0_32 = arith.constant 0 : index
      %79 = vector.load %arg4[%c0_30, %c1, %c0_31, %c0_32] : memref<1x4x8x128xf32, #tpu.memory_space<vmem>>, vector<1x1x8x128xf32>
      %80 = vector.shape_cast %79 : vector<1x1x8x128xf32> to vector<8x128xf32>
      %81 = arith.addf %80, %66 : vector<8x128xf32>
      %c0_33 = arith.constant 0 : index
      %c1_34 = arith.constant 1 : index
      %c0_35 = arith.constant 0 : index
      %c0_36 = arith.constant 0 : index
      %82 = vector.load %arg4[%c0_33, %c1_34, %c0_35, %c0_36] : memref<1x4x8x128xf32, #tpu.memory_space<vmem>>, vector<1x1x8x128xf32>
      %83 = vector.shape_cast %82 : vector<1x1x8x128xf32> to vector<8x128xf32>
      %84 = vector.shape_cast %81 : vector<8x128xf32> to vector<1x1x8x128xf32>
      tpu.vector_store %arg4[%c0_33, %c1_34, %c0_35, %c0_36], %84 {strides = array<i32>} : memref<1x4x8x128xf32, #tpu.memory_space<vmem>>, vector<1x1x8x128xf32>,
      %c0_37 = arith.constant 0 : index
      %c2 = arith.constant 2 : index
      %c0_38 = arith.constant 0 : index
      %c0_39 = arith.constant 0 : index
      %85 = vector.load %arg4[%c0_37, %c2, %c0_38, %c0_39] : memref<1x4x8x128xf32, #tpu.memory_space<vmem>>, vector<1x1x8x128xf32>
      %86 = vector.shape_cast %85 : vector<1x1x8x128xf32> to vector<8x128xf32>
      %87 = arith.addf %86, %69 : vector<8x128xf32>
      %c0_40 = arith.constant 0 : index
      %c2_41 = arith.constant 2 : index
      %c0_42 = arith.constant 0 : index
      %c0_43 = arith.constant 0 : index
      %88 = vector.load %arg4[%c0_40, %c2_41, %c0_42, %c0_43] : memref<1x4x8x128xf32, #tpu.memory_space<vmem>>, vector<1x1x8x128xf32>
      %89 = vector.shape_cast %88 : vector<1x1x8x128xf32> to vector<8x128xf32>
      %90 = vector.shape_cast %87 : vector<8x128xf32> to vector<1x1x8x128xf32>
      tpu.vector_store %arg4[%c0_40, %c2_41, %c0_42, %c0_43], %90 {strides = array<i32>} : memref<1x4x8x128xf32, #tpu.memory_space<vmem>>, vector<1x1x8x128xf32>,
      %c0_44 = arith.constant 0 : index
      %c3 = arith.constant 3 : index
      %c0_45 = arith.constant 0 : index
      %c0_46 = arith.constant 0 : index
      %91 = vector.load %arg4[%c0_44, %c3, %c0_45, %c0_46] : memref<1x4x8x128xf32, #tpu.memory_space<vmem>>, vector<1x1x8x128xf32>
      %92 = vector.shape_cast %91 : vector<1x1x8x128xf32> to vector<8x128xf32>
      %93 = arith.addf %92, %72 : vector<8x128xf32>
      %c0_47 = arith.constant 0 : index
      %c3_48 = arith.constant 3 : index
      %c0_49 = arith.constant 0 : index
      %c0_50 = arith.constant 0 : index
      %94 = vector.load %arg4[%c0_47, %c3_48, %c0_49, %c0_50] : memref<1x4x8x128xf32, #tpu.memory_space<vmem>>, vector<1x1x8x128xf32>
      %95 = vector.shape_cast %94 : vector<1x1x8x128xf32> to vector<8x128xf32>
      %96 = vector.shape_cast %93 : vector<8x128xf32> to vector<1x1x8x128xf32>
      tpu.vector_store %arg4[%c0_47, %c3_48, %c0_49, %c0_50], %96 {strides = array<i32>} : memref<1x4x8x128xf32, #tpu.memory_space<vmem>>, vector<1x1x8x128xf32>,
    } else {
    }
    %11 = arith.extui %7 : i1 to i32
    %c0_i32_3 = arith.constant 0 : i32
    %12 = arith.cmpi ne, %11, %c0_i32_3 : i32
    scf.if %12 {
      %cst = arith.constant 0.000000e+00 : f32
      %13 = vector.broadcast %cst : f32 to vector<8x128xf32>
      %c0_i32_4 = arith.constant 0 : i32
      %c8_i32 = arith.constant 8 : i32
      %14 = arith.muli %c0_i32_4, %c8_i32 : i32
      %15 = tpu.assume_multiple %14, 8 : i32
      %16 = arith.index_cast %15 : i32 to index
      %c0 = arith.constant 0 : index
      %17 = vector.load %arg2[%16, %c0] : memref<8x128xf32, #tpu.memory_space<vmem>>, vector<8x128xf32>
      %18 = arith.index_cast %15 : i32 to index
      %c0_5 = arith.constant 0 : index
      %19 = vector.load %arg3[%18, %c0_5] : memref<8x128xf32, #tpu.memory_space<vmem>>, vector<8x128xf32>
      %20 = tpu.iota {dimensions = array<i32: 0>} : vector<8x128xi32>
      %21 = tpu.iota {dimensions = array<i32: 1>} : vector<8x128xi32>
      %c8_i32_6 = arith.constant 8 : i32
      %22 = arith.muli %4, %c8_i32_6 : i32
      %c8_i32_7 = arith.constant 8 : i32
      %23 = arith.muli %c0_i32_4, %c8_i32_7 : i32
      %24 = arith.addi %22, %23 : i32
      %c128_i32 = arith.constant 128 : i32
      %25 = arith.muli %24, %c128_i32 : i32
      %c128_i32_8 = arith.constant 128 : i32
      %26 = vector.broadcast %c128_i32_8 : i32 to vector<8x128xi32>
      %27 = arith.muli %20, %26 : vector<8x128xi32>
      %28 = vector.broadcast %25 : i32 to vector<8x128xi32>
      %29 = arith.addi %28, %27 : vector<8x128xi32>
      %30 = arith.addi %29, %21 : vector<8x128xi32>
      %c256_i32_9 = arith.constant 256 : i32
      %31 = vector.broadcast %c256_i32_9 : i32 to vector<8x128xi32>
      %32 = arith.cmpi slt, %30, %31 : vector<8x128xi32>
      %33 = math.absf %17 : vector<8x128xf32>
      %cst_10 = arith.constant 0.000000e+00 : f32
      %34 = vector.broadcast %cst_10 : f32 to vector<8x128xf32>
      %35 = arith.subf %34, %33 : vector<8x128xf32>
      %36 = math.exp %35 : vector<8x128xf32>
      %cst_11 = arith.constant 1.000000e+00 : f32
      %37 = vector.broadcast %cst_11 : f32 to vector<8x128xf32>
      %38 = arith.addf %37, %36 : vector<8x128xf32>
      %39 = tpu.reciprocal %38 {approx = true} : vector<8x128xf32> -> vector<8x128xf32>
      %40 = arith.mulf %38, %39 : vector<8x128xf32>
      %cst_12 = arith.constant 2.000000e+00 : f32
      %41 = vector.broadcast %cst_12 : f32 to vector<8x128xf32>
      %42 = arith.subf %41, %40 : vector<8x128xf32>
      %43 = arith.mulf %39, %42 : vector<8x128xf32>
      %cst_13 = arith.constant 0.000000e+00 : f32
      %44 = vector.broadcast %cst_13 : f32 to vector<8x128xf32>
      %45 = arith.cmpf oge, %17, %44 : vector<8x128xf32>
      %46 = arith.mulf %36, %43 : vector<8x128xf32>
      %47 = arith.select %45, %43, %46 : vector<8x128xi1>, vector<8x128xf32>
      %cst_14 = arith.constant 0.000000e+00 : f32
      %48 = vector.broadcast %cst_14 : f32 to vector<8x128xf32>
      %49 = arith.maximumf %17, %48 : vector<8x128xf32>
      %50 = arith.mulf %17, %19 : vector<8x128xf32>
      %51 = arith.subf %49, %50 : vector<8x128xf32>
      %52 = math.log1p %36 : vector<8x128xf32>
      %53 = arith.addf %51, %52 : vector<8x128xf32>
      %cst_15 = arith.constant 0.000000e+00 : f32
      %54 = vector.broadcast %cst_15 : f32 to vector<8x128xf32>
      %55 = arith.select %32, %47, %54 : vector<8x128xi1>, vector<8x128xf32>
      %56 = arith.select %32, %19, %54 : vector<8x128xi1>, vector<8x128xf32>
      %57 = arith.select %32, %53, %54 : vector<8x128xi1>, vector<8x128xf32>
      %58 = arith.mulf %55, %56 : vector<8x128xf32>
      %cst_16 = arith.constant 1.000000e+00 : f32
      %59 = vector.broadcast %cst_16 : f32 to vector<8x128xf32>
      %60 = arith.subf %59, %55 : vector<8x128xf32>
      %cst_17 = arith.constant 1.000000e+00 : f32
      %61 = vector.broadcast %cst_17 : f32 to vector<8x128xf32>
      %62 = arith.subf %61, %56 : vector<8x128xf32>
      %63 = arith.mulf %60, %62 : vector<8x128xf32>
      %64 = arith.addf %58, %63 : vector<8x128xf32>
      %cst_18 = arith.constant 2.500000e-01 : f32
      %65 = vector.broadcast %cst_18 : f32 to vector<8x128xf32>
      %66 = arith.mulf %65, %56 : vector<8x128xf32>
      %cst_19 = arith.constant 1.000000e+00 : f32
      %67 = vector.broadcast %cst_19 : f32 to vector<8x128xf32>
      %68 = arith.subf %67, %56 : vector<8x128xf32>
      %cst_20 = arith.constant 7.500000e-01 : f32
      %69 = vector.broadcast %cst_20 : f32 to vector<8x128xf32>
      %70 = arith.mulf %69, %68 : vector<8x128xf32>
      %71 = arith.addf %66, %70 : vector<8x128xf32>
      %cst_21 = arith.constant 1.000000e+00 : f32
      %72 = vector.broadcast %cst_21 : f32 to vector<8x128xf32>
      %73 = arith.subf %72, %64 : vector<8x128xf32>
      %74 = arith.mulf %73, %73 : vector<8x128xf32>
      %75 = arith.mulf %71, %74 : vector<8x128xf32>
      %76 = arith.mulf %75, %57 : vector<8x128xf32>
      %77 = arith.mulf %55, %56 : vector<8x128xf32>
      %78 = vector.shape_cast %76 : vector<8x128xf32> to vector<1x8x128xf32>
      %cst_22 = arith.constant dense<0.000000e+00> : vector<8x128xf32>
      %79 = vector.multi_reduction <add>, %78, %cst_22 [0] : vector<1x8x128xf32> to vector<8x128xf32>
      %80 = arith.addf %13, %79 : vector<8x128xf32>
      %81 = vector.shape_cast %77 : vector<8x128xf32> to vector<1x8x128xf32>
      %cst_23 = arith.constant dense<0.000000e+00> : vector<8x128xf32>
      %82 = vector.multi_reduction <add>, %81, %cst_23 [0] : vector<1x8x128xf32> to vector<8x128xf32>
      %83 = arith.addf %13, %82 : vector<8x128xf32>
      %84 = vector.shape_cast %55 : vector<8x128xf32> to vector<1x8x128xf32>
      %cst_24 = arith.constant dense<0.000000e+00> : vector<8x128xf32>
      %85 = vector.multi_reduction <add>, %84, %cst_24 [0] : vector<1x8x128xf32> to vector<8x128xf32>
      %86 = arith.addf %13, %85 : vector<8x128xf32>
      %87 = vector.shape_cast %56 : vector<8x128xf32> to vector<1x8x128xf32>
      %cst_25 = arith.constant dense<0.000000e+00> : vector<8x128xf32>
      %88 = vector.multi_reduction <add>, %87, %cst_25 [0] : vector<1x8x128xf32> to vector<8x128xf32>
      %89 = arith.addf %13, %88 : vector<8x128xf32>
      %c1_i32_26 = arith.constant 1 : i32
      %c0_27 = arith.constant 0 : index
      %c0_28 = arith.constant 0 : index
      %c0_29 = arith.constant 0 : index
      %c0_30 = arith.constant 0 : index
      %90 = vector.load %arg4[%c0_27, %c0_28, %c0_29, %c0_30] : memref<1x4x8x128xf32, #tpu.memory_space<vmem>>, vector<1x1x8x128xf32>
      %91 = vector.shape_cast %90 : vector<1x1x8x128xf32> to vector<8x128xf32>
      %92 = arith.addf %91, %80 : vector<8x128xf32>
      %c0_31 = arith.constant 0 : index
      %c0_32 = arith.constant 0 : index
      %c0_33 = arith.constant 0 : index
      %c0_34 = arith.constant 0 : index
      %93 = vector.load %arg4[%c0_31, %c0_32, %c0_33, %c0_34] : memref<1x4x8x128xf32, #tpu.memory_space<vmem>>, vector<1x1x8x128xf32>
      %94 = vector.shape_cast %93 : vector<1x1x8x128xf32> to vector<8x128xf32>
      %95 = vector.shape_cast %92 : vector<8x128xf32> to vector<1x1x8x128xf32>
      tpu.vector_store %arg4[%c0_31, %c0_32, %c0_33, %c0_34], %95 {strides = array<i32>} : memref<1x4x8x128xf32, #tpu.memory_space<vmem>>, vector<1x1x8x128xf32>,
      %c0_35 = arith.constant 0 : index
      %c1 = arith.constant 1 : index
      %c0_36 = arith.constant 0 : index
      %c0_37 = arith.constant 0 : index
      %96 = vector.load %arg4[%c0_35, %c1, %c0_36, %c0_37] : memref<1x4x8x128xf32, #tpu.memory_space<vmem>>, vector<1x1x8x128xf32>
      %97 = vector.shape_cast %96 : vector<1x1x8x128xf32> to vector<8x128xf32>
      %98 = arith.addf %97, %83 : vector<8x128xf32>
      %c0_38 = arith.constant 0 : index
      %c1_39 = arith.constant 1 : index
      %c0_40 = arith.constant 0 : index
      %c0_41 = arith.constant 0 : index
      %99 = vector.load %arg4[%c0_38, %c1_39, %c0_40, %c0_41] : memref<1x4x8x128xf32, #tpu.memory_space<vmem>>, vector<1x1x8x128xf32>
      %100 = vector.shape_cast %99 : vector<1x1x8x128xf32> to vector<8x128xf32>
      %101 = vector.shape_cast %98 : vector<8x128xf32> to vector<1x1x8x128xf32>
      tpu.vector_store %arg4[%c0_38, %c1_39, %c0_40, %c0_41], %101 {strides = array<i32>} : memref<1x4x8x128xf32, #tpu.memory_space<vmem>>, vector<1x1x8x128xf32>,
      %c0_42 = arith.constant 0 : index
      %c2 = arith.constant 2 : index
      %c0_43 = arith.constant 0 : index
      %c0_44 = arith.constant 0 : index
      %102 = vector.load %arg4[%c0_42, %c2, %c0_43, %c0_44] : memref<1x4x8x128xf32, #tpu.memory_space<vmem>>, vector<1x1x8x128xf32>
      %103 = vector.shape_cast %102 : vector<1x1x8x128xf32> to vector<8x128xf32>
      %104 = arith.addf %103, %86 : vector<8x128xf32>
      %c0_45 = arith.constant 0 : index
      %c2_46 = arith.constant 2 : index
      %c0_47 = arith.constant 0 : index
      %c0_48 = arith.constant 0 : index
      %105 = vector.load %arg4[%c0_45, %c2_46, %c0_47, %c0_48] : memref<1x4x8x128xf32, #tpu.memory_space<vmem>>, vector<1x1x8x128xf32>
      %106 = vector.shape_cast %105 : vector<1x1x8x128xf32> to vector<8x128xf32>
      %107 = vector.shape_cast %104 : vector<8x128xf32> to vector<1x1x8x128xf32>
      tpu.vector_store %arg4[%c0_45, %c2_46, %c0_47, %c0_48], %107 {strides = array<i32>} : memref<1x4x8x128xf32, #tpu.memory_space<vmem>>, vector<1x1x8x128xf32>,
      %c0_49 = arith.constant 0 : index
      %c3 = arith.constant 3 : index
      %c0_50 = arith.constant 0 : index
      %c0_51 = arith.constant 0 : index
      %108 = vector.load %arg4[%c0_49, %c3, %c0_50, %c0_51] : memref<1x4x8x128xf32, #tpu.memory_space<vmem>>, vector<1x1x8x128xf32>
      %109 = vector.shape_cast %108 : vector<1x1x8x128xf32> to vector<8x128xf32>
      %110 = arith.addf %109, %89 : vector<8x128xf32>
      %c0_52 = arith.constant 0 : index
      %c3_53 = arith.constant 3 : index
      %c0_54 = arith.constant 0 : index
      %c0_55 = arith.constant 0 : index
      %111 = vector.load %arg4[%c0_52, %c3_53, %c0_54, %c0_55] : memref<1x4x8x128xf32, #tpu.memory_space<vmem>>, vector<1x1x8x128xf32>
      %112 = vector.shape_cast %111 : vector<1x1x8x128xf32> to vector<8x128xf32>
      %113 = vector.shape_cast %110 : vector<8x128xf32> to vector<1x1x8x128xf32>
      tpu.vector_store %arg4[%c0_52, %c3_53, %c0_54, %c0_55], %113 {strides = array<i32>} : memref<1x4x8x128xf32, #tpu.memory_space<vmem>>, vector<1x1x8x128xf32>,
    } else {
    }
    return
  }
  func.func @transform_0(%arg0: i32, %arg1: i32) -> (i32, i32) {
    %c1_i32 = arith.constant 1 : i32
    %0 = arith.muli %arg0, %c1_i32 : i32
    %1 = arith.addi %0, %arg1 : i32
    %c0_i32 = arith.constant 0 : i32
    %2 = arith.minsi %1, %c0_i32 : i32
    %c0_i32_0 = arith.constant 0 : i32
    %c0_i32_1 = arith.constant 0 : i32
    return %2, %c0_i32_0 : i32, i32
  }
  func.func @transform_1(%arg0: i32, %arg1: i32) -> (i32, i32) {
    %c1_i32 = arith.constant 1 : i32
    %0 = arith.muli %arg0, %c1_i32 : i32
    %1 = arith.addi %0, %arg1 : i32
    %c0_i32 = arith.constant 0 : i32
    %2 = arith.minsi %1, %c0_i32 : i32
    %c0_i32_0 = arith.constant 0 : i32
    %c0_i32_1 = arith.constant 0 : i32
    return %2, %c0_i32_0 : i32, i32
  }
  func.func @transform_2(%arg0: i32, %arg1: i32) -> (i32, i32, i32, i32) {
    %c0_i32 = arith.constant 0 : i32
    %c0_i32_0 = arith.constant 0 : i32
    %c0_i32_1 = arith.constant 0 : i32
    %c0_i32_2 = arith.constant 0 : i32
    return %arg0, %c0_i32, %c0_i32_0, %c0_i32_1 : i32, i32, i32, i32
  }
}

</mosaic_0001>

<bundles_post_ra>
// kernel: tpu_custom_call.1
= control target key start
LH: loop header
LB: loop body
LE: loop exit
PB: predicated region body
PF: predicated region fallthrough
CT: control target
= control target key end

     0   :  { %7 = vsyncpa [#allocation3], 0  ;;  %s377_s0 = inlined_call_operand.hbm [shape: f32[2,128], index: 0, kind: input, shape index: {}]   ;;  %s378_s1 = inlined_call_operand.vmem [shape: f32[2,128], index: 1, kind: input, shape index: {}]   ;;  %s379_s2 = inlined_call_operand.hbm [shape: f32[1,4,8,128], index: 2, kind: output, shape index: {}]  }
   0x1   :  { %8 = vsyncpa [#allocation4], 0 }
   0x2   :  { %19 = vsyncadd [#allocation3], 96  ;;  %s326_s9 = smov [#allocation2]   ;;  %s278_s13 = scalar_lea.hbm %s377_s0, 32 }
   0x3   :  { %s24_s10 = sshll.u32 %s326_s9, 4  ;;  %p279_p0 = scmp.ne.s32.totalorder %s377_s0, %s278_s13  ;;  %s25_s10 = int_to_ptr.vmem [resolvable:$true] %s24_s10 }
   0x4   :  { %p282_p1 = scmp.lt.u32.totalorder %s278_s13, %s377_s0 }
   0x6   :  { %p284_p2 = pnand %p282_p1, %p279_p0 }
   0x8   :  { %287 = shalt.err (!%p284_p2)
}
   0x9   :  { %s288_s18 = scalar_lea.vmem %s25_s10, 32  ;;  %s292_s19 = scalar_lea.vmem %s25_s10, 128 }
   0xa   :  { %p289_p3 = scmp.ne.s32.totalorder %s25_s10, %s288_s18  ;;  %p293_p4 = scmp.lt.s32.totalorder %s25_s10, %s25_s10 }
   0xb   :  { %p294_p5 = scmp.lt.s32.totalorder %s292_s19, %s288_s18 }
   0xd   :  { %p295_p6 = por %p294_p5, %p293_p4 }
   0xf   :  { %p296_p7 = pnand %p295_p6, %p289_p3 }
  0x11   :  { %299 = shalt.err (!%p296_p7)
}
  0x12   :  { %s327_s20 = smov 32   ;;  %s328_s21 = smov 2  }
  0x13   :  { %30 = dma.hbm_to_vmem [thread:$0]  %s377_s0, 32, %s25_s10, [#allocation3], %s327_s20, %s327_s20, %s328_s21  }
  0x14   :  { %322 = dma.done.wait [#allocation3], 128  }
  0x15   :  { %323 = vsyncadd [#allocation3], 4294967168  ;;  %v167_v0 = vlaneseq  ;;  %v165_v5 = vld [vmem:[#allocation2] sm:$0xff]  ;;  %s329_s0 = smov [#allocation5]  }
  0x16   :  { %v166_v6 = vld [vmem:[%s378_s1] sm:$0xff]  ;;  %v177_v7 = vand.u32 2147483647, %v165_v5  ;;  %vm186_vm1 = vcmp.ge.f32.partialorder %v165_v5, 0.0  ;;  %v189_v22 = vmax.f32 %v165_v5, 0.0  ;;  %s245_s1 = sshll.u32 %s329_s0, 4  ;;  %s246_s1 = int_to_ptr.vmem [resolvable:$true] %s245_s1 }
  0x17   :  { %v168_v1 = vshrl.u32 %v167_v0, 7  ;;  %v170_v2 = vand.u32 127, %v167_v0  ;;  %v190_v23 = vmul.f32 %v166_v6, %v165_v5  ;;  %s300_s26 = scalar_lea.vmem %s246_s1, 512  ;;  %p305_p9 = scmp.lt.s32.totalorder %s246_s1, %s246_s1 }
  0x18   :  { %v178_v9 = vsub.f32 0.0, %v177_v7  ;;  %p301_p8 = scmp.ne.s32.totalorder %s246_s1, %s300_s26  ;;  %p306_p10 = scmp.lt.s32.totalorder %s300_s26, %s300_s26 }
  0x19   :  { %v172_v3 = vmul.u32 128, %v168_v1  ;;  %v191_v31 = vsub.f32 %v189_v22, %v190_v23 }
  0x1a   :  { %v179_v10 = vmul.f32 1.442695, %v178_v9  ;;  %p307_p11 = por %p306_p10, %p305_p9 }
  0x1b   :  { %v175_v4 = vadd.s32 %v172_v3, %v170_v2 }
  0x1c   :  { %272 = vpow2.f32 %v179_v10  ;;  %p308_p12 = pnand %p307_p11, %p301_p8 }
  0x1d   :  { %vm176_vm0 = vcmp.lt.s32.totalorder %v175_v4, 256 }
  0x1e   :  { %v203_v8 = vsel %vm176_vm0, %v166_v6, 0.0 }
  0x1f   :  { %239 = vst [vmem:[#allocation5 + $0x18] sm:$0xff] %v203_v8  ;;  %v207_v27 = vsub.f32 1.0, %v203_v8  ;;  %v210_v32 = vmul.f32 0.25, %v203_v8 }
  0x21   :  { %v211_v35 = vmul.f32 0.75, %v207_v27 }
  0x23   :  { %v212_v38 = vadd.f32 %v211_v35, %v210_v32 }
  0x26   :  { %v273_v11 = vpop.eup %272 }
  0x27   :  { %v181_v12 = vadd.f32 1.0, %v273_v11  ;;  %v195_v15 = vmul.f32 -0.5, %v273_v11  ;;  %v198_v20 = vand.u32 2147483647, %v273_v11 }
  0x29   :  { %274 = vrcp.f32 %v181_v12  ;;  %v196_v18 = vadd.f32 1.0, %v195_v15  ;;  %vm199_vm2 = vcmp.lt.f32.partialorder %v198_v20, 0.0004427343 }
  0x2a   :  { %276 = vlog2.f32 %v181_v12 }
  0x2b   :  { %v197_v26 = vmul.f32 %v273_v11, %v196_v18 }
  0x33   :  { %v275_v13 = vpop.eup %274 }
  0x34   :  { %v183_v14 = vmul.f32 %v275_v13, %v181_v12  ;;  %v277_v19 = vpop.eup %276 }
  0x35   :  { %v194_v25 = vmul.f32 0.6931472, %v277_v19 }
  0x36   :  { %v184_v16 = vsub.f32 2.0, %v183_v14 }
  0x37   :  { %v200_v33 = vsel %vm199_vm2, %v197_v26, %v194_v25 }
  0x38   :  { %v185_v17 = vmul.f32 %v275_v13, %v184_v16  ;;  %v201_v37 = vadd.f32 %v200_v33, %v191_v31 }
  0x3a   :  { %v187_v21 = vmul.f32 %v273_v11, %v185_v17  ;;  %v204_v41 = vsel %vm176_vm0, %v201_v37, 0.0 }
  0x3c   :  { %v188_v24 = vsel %vm186_vm1, %v185_v17, %v187_v21 }
  0x3d   :  { %v202_v28 = vsel %vm176_vm0, %v188_v24, 0.0 }
  0x3e   :  { %v205_v29 = vmul.f32 %v203_v8, %v202_v28  ;;  %v206_v30 = vsub.f32 1.0, %v202_v28  ;;  %235 = vst [vmem:[#allocation5 + $0x10] sm:$0xff] %v202_v28 }
  0x40   :  { %v208_v34 = vmul.f32 %v207_v27, %v206_v30  ;;  %231 = vst [vmem:[#allocation5 + $0x8] sm:$0xff] %v205_v29 }
  0x42   :  { %v209_v36 = vadd.f32 %v208_v34, %v205_v29 }
  0x44   :  { %v213_v39 = vsub.f32 1.0, %v209_v36 }
  0x46   :  { %v214_v40 = vmul.f32 %v213_v39, %v213_v39 }
  0x48   :  { %v215_v42 = vmul.f32 %v214_v40, %v212_v38 }
  0x4a   :  { %v216_v43 = vmul.f32 %v215_v42, %v204_v41 }
  0x4c   :  { %227 = vst [vmem:[#allocation5] sm:$0xff] %v216_v43 }
  0x4d   :  { %311 = shalt.err (!%p308_p12)
}
  0x4e   :  { %s312_s29 = scalar_lea.hbm %s379_s2, 512 }
  0x4f   :  { %p313_p13 = scmp.ne.s32.totalorder %s379_s2, %s312_s29  ;;  %p316_p0 = scmp.lt.u32.totalorder %s312_s29, %s379_s2 }
  0x51   :  { %p318_p1 = pnand %p316_p0, %p313_p13 }
  0x53   :  { %321 = shalt.err (!%p318_p1)
}
  0x54   :  { %s330_s6 = smov 128   ;;  %s331_s7 = smov 8  }
  0x55   :  { %251 = dma.vmem_to_hbm [thread:$0]  %s246_s1, 512, %s379_s2, [#allocation4], %s330_s6, %s330_s6, %s331_s7  }
  0x56   :  { %324 = dma.done.wait [#allocation4], 512  }
  0x57   :  { %325 = vsyncadd [#allocation4], 4294966784 }
  0x58   :  { %255 = vsyncpa [#allocation3], 1 }
  0x59   :  { %256 = vsyncpa [#allocation4], 1 }

</bundles_post_ra>
